<compile_context>
chip_gen: v6e
topology: v6e:2x2x1
jax: 0.10.0
libtpu: 0.0.40
codegen_flags: <defaults>
</compile_context>

<pallas_src>
import math

import jax
import jax.numpy as jnp
from jax.experimental import pallas as pl
from jax.experimental.pallas import tpu as pltpu

_LANES = 128
_SUBLANES = 8


def _round_up(a, b):
    return -(-a // b) * b


def _device_kind():
    try:
        return jax.devices()[0].device_kind.lower()
    except Exception:
        return ""


def _core_split():
    # 2-way "parallel" split only pays on v7x (2 TensorCores/chip);
    # v5e/v6e are single-core, where the extra axis is just a serial loop.
    return 2 if "v7" in _device_kind() else 1


def _tile_budget_bytes():
    kind = _device_kind()
    if "v7" in kind:
        return 2 * 1024 * 1024      # amortize ~0.35us/step overhead at 3.2 TB/s
    if "v5" in kind:
        return 512 * 1024           # v5e: 16 MiB scoped-VMEM default
    return 1 * 1024 * 1024          # v6e and default


def _make_kernel(tiles_per_core, tile_rows, rows_total, needs_mask):
    def kernel(xhat_ref, tgt_ref, out_ref, acc_ref):
        c = pl.program_id(0)                 # parallel (core) axis
        i = pl.program_id(1)                 # arbitrary (streaming) axis

        @pl.when(i == 0)
        def _init():
            acc_ref[...] = jnp.zeros_like(acc_ref)

        # Hot streaming path: native-dtype load, in-kernel f32 cast, sub,
        # (mask,) square — all VPU, fully hidden under the HBM DMAs.
        d = xhat_ref[...].astype(jnp.float32) - tgt_ref[...].astype(jnp.float32)
        if needs_mask:
            # Mask uses the *unclamped* block id, so rows belonging to the
            # ragged tail (or to clamped fully-OOB blocks) contribute zero.
            row0 = (c * tiles_per_core + i) * tile_rows
            rows = row0 + jax.lax.broadcasted_iota(jnp.int32, d.shape, 0)
            d = jnp.where(rows < rows_total, d, 0.0)
        sq = d * d
        # (tile_rows, cols) -> (tile_rows//8, 8, cols); reducing the leading
        # axis is pure VALU adds — no XLU reduce / SMEM RMW in the loop body.
        acc_ref[...] += jnp.sum(
            sq.reshape(tile_rows // _SUBLANES, _SUBLANES, sq.shape[-1]), axis=0)

        @pl.when(i == pl.num_programs(1) - 1)
        def _finalize():
            out_ref[0] = acc_ref[...]

    return kernel


def rate_distortion_loss(x_hat, target, y_lik, z_lik, lmbda=0.01, alpha=0):
    # `alpha` accepted for API parity; the reference forward() never uses it.
    del alpha
    N, C, H, W = target.shape
    num_pixels = N * H * W
    num_elems = N * C * H * W

    # --- free contiguous reshape of the streamed image tensors (no pad copy) -
    cols = _LANES if num_elems % _LANES == 0 else W   # last dim == full dim OK
    rows_total = num_elems // cols
    xh = x_hat.reshape(rows_total, cols)
    tg = target.reshape(rows_total, cols)

    # --- generation-aware tile geometry -------------------------------------
    core_split = _core_split()
    bytes_per_row = _round_up(cols, _LANES) * 4       # f32-equivalent VMEM rows
    cap_rows = max(_SUBLANES,
                   (_tile_budget_bytes() // bytes_per_row)
                   // _SUBLANES * _SUBLANES)

    half_rows = -(-rows_total // core_split)
    tiles_per_core = max(1, -(-half_rows // cap_rows))
    tile_rows = _round_up(max(1, -(-half_rows // tiles_per_core)), _SUBLANES)
    coverage = core_split * tiles_per_core * tile_rows
    needs_mask = coverage != rows_total
    max_block = max(0, -(-rows_total // tile_rows) - 1)   # last in-bounds block

    def img_map(c, i):
        # Clamp so no block is *fully* out of bounds; the in-kernel mask
        # (computed from the unclamped block id) zeroes any clamped rows.
        return (jnp.minimum(c * tiles_per_core + i, max_block), 0)

    grid = (core_split, tiles_per_core)
    img_spec = pl.BlockSpec((tile_rows, cols), img_map)
    out_spec = pl.BlockSpec((1, _SUBLANES, cols), lambda c, i: (c, 0, 0))
    out_shape = jax.ShapeDtypeStruct((core_split, _SUBLANES, cols), jnp.float32)

    cost = pl.CostEstimate(
        flops=int(3 * num_elems),
        transcendentals=0,
        bytes_accessed=int(xh.size * xh.dtype.itemsize
                           + tg.size * tg.dtype.itemsize
                           + core_split * _SUBLANES * cols * 4))

    partials = pl.pallas_call(
        _make_kernel(tiles_per_core, tile_rows, rows_total, needs_mask),
        out_shape=out_shape,
        grid=grid,
        in_specs=[img_spec, img_spec],
        out_specs=out_spec,
        scratch_shapes=[pltpu.VMEM((_SUBLANES, cols), jnp.float32)],
        compiler_params=pltpu.CompilerParams(
            dimension_semantics=("parallel", "arbitrary")),
        cost_estimate=cost,
    )(xh, tg)

    # Tiny cross-lane reduce of the per-core (8, cols) partials: free in XLA.
    sum_sq = jnp.sum(partials)

    # Latent likelihood log-sums: small tensors, plain jnp (XLA fuses
    # log+reduce); keeps them off the bandwidth-bound stream and off v7x VMEM.
    sum_log_y = jnp.sum(jnp.log(y_lik.astype(jnp.float32)))
    sum_log_z = jnp.sum(jnp.log(z_lik.astype(jnp.float32)))

    inv_bpp = 1.0 / (-math.log(2.0) * num_pixels)
    y_bpp = sum_log_y * inv_bpp
    z_bpp = sum_log_z * inv_bpp
    bpp = y_bpp + z_bpp
    mse = sum_sq * (255.0 ** 2 / num_elems)
    loss = lmbda * mse + bpp
    return {
        "loss": loss,
        "mse_loss": mse,
        "bpp_loss": bpp,
        "y_bpp_loss": y_bpp,
        "z_bpp_loss": z_bpp,
    }


def _reference(x_hat, target, y_lik, z_lik, lmbda=0.01):
    N, C, H, W = target.shape
    num_pixels = N * H * W
    inv = 1.0 / (-math.log(2.0) * num_pixels)
    y_bpp = jnp.sum(jnp.log(y_lik)) * inv
    z_bpp = jnp.sum(jnp.log(z_lik)) * inv
    bpp = y_bpp + z_bpp
    mse = jnp.mean((x_hat - target) ** 2) * 255.0 ** 2
    return {"loss": lmbda * mse + bpp, "mse_loss": mse, "bpp_loss": bpp,
            "y_bpp_loss": y_bpp, "z_bpp_loss": z_bpp}


if __name__ == "__main__":
    key = jax.random.PRNGKey(0)
    k1, k2, k3, k4 = jax.random.split(key, 4)

    # Small shapes consistent with a compression model:
    #   target / x_hat : (N=2, C=3, H=16, W=16)  NCHW
    #   y likelihoods  : (2, 8, 8, 8)   (downsampled latent)
    #   z likelihoods  : (2, 4, 4, 4)   (hyper-latent)
    target = jax.random.uniform(k1, (2, 3, 16, 16), jnp.float32)
    x_hat = target + 0.05 * jax.random.normal(k2, (2, 3, 16, 16), jnp.float32)
    y_lik = jax.random.uniform(k3, (2, 8, 8, 8), jnp.float32,
                               minval=0.01, maxval=1.0)
    z_lik = jax.random.uniform(k4, (2, 4, 4, 4), jnp.float32,
                               minval=0.01, maxval=1.0)

    out = rate_distortion_loss(x_hat, target, y_lik, z_lik, lmbda=0.01)
    jax.block_until_ready(out["loss"])

    ref = _reference(x_hat, target, y_lik, z_lik, lmbda=0.01)
    for k in out:
        assert jnp.allclose(out[k], ref[k], rtol=1e-5, atol=1e-5), (
            f"mismatch for {k}: {out[k]} vs {ref[k]}")

    print("KERNEL_OK")
</pallas_src>

<mosaic_0001>
module attributes {stable_mosaic.version = 11 : i64} {
  func.func @kernel(%arg0: i32, %arg1: i32, %arg2: memref<16x128xf32, #tpu.memory_space<vmem>>, %arg3: memref<16x128xf32, #tpu.memory_space<vmem>>, %arg4: memref<1x8x128xf32, #tpu.memory_space<vmem>>, %arg5: memref<8x128xf32, #tpu.memory_space<vmem>>) attributes {dimension_semantics = [#tpu.dimension_semantics<parallel>, #tpu.dimension_semantics<arbitrary>], iteration_bounds = array<i64: 1, 1>, scalar_prefetch = 0 : i64, scratch_operands = 1 : i64, tpu.core_type = #tpu.core_type<tc>, window_params = [{transform_indices = @transform_0, window_bounds = array<i64: 16, 128>}, {transform_indices = @transform_1, window_bounds = array<i64: 16, 128>}, {transform_indices = @transform_2, window_bounds = array<i64: 1, 8, 128>}]} {
    %c0_i32 = arith.constant 0 : i32
    %0 = arith.cmpi eq, %arg1, %c0_i32 : i32
    %1 = arith.extui %0 : i1 to i32
    %c0_i32_0 = arith.constant 0 : i32
    %2 = arith.cmpi ne, %1, %c0_i32_0 : i32
    scf.if %2 {
      %cst_11 = arith.constant 0.000000e+00 : f32
      %25 = vector.broadcast %cst_11 : f32 to vector<8x128xf32>
      %c0_12 = arith.constant 0 : index
      %c0_13 = arith.constant 0 : index
      %26 = vector.load %arg5[%c0_12, %c0_13] : memref<8x128xf32, #tpu.memory_space<vmem>>, vector<8x128xf32>
      tpu.vector_store %arg5[%c0_12, %c0_13], %25 {strides = array<i32>} : memref<8x128xf32, #tpu.memory_space<vmem>>, vector<8x128xf32>,
    } else {
    }
    %c0 = arith.constant 0 : index
    %c0_1 = arith.constant 0 : index
    %3 = vector.load %arg2[%c0, %c0_1] : memref<16x128xf32, #tpu.memory_space<vmem>>, vector<16x128xf32>
    %c0_2 = arith.constant 0 : index
    %c0_3 = arith.constant 0 : index
    %4 = vector.load %arg3[%c0_2, %c0_3] : memref<16x128xf32, #tpu.memory_space<vmem>>, vector<16x128xf32>
    %5 = arith.subf %3, %4 : vector<16x128xf32>
    %c1_i32 = arith.constant 1 : i32
    %6 = arith.muli %arg0, %c1_i32 : i32
    %7 = arith.addi %6, %arg1 : i32
    %c16_i32 = arith.constant 16 : i32
    %8 = arith.muli %7, %c16_i32 : i32
    %9 = tpu.iota {dimensions = array<i32: 0>} : vector<16x128xi32>
    %10 = vector.broadcast %8 : i32 to vector<16x128xi32>
    %11 = arith.addi %10, %9 : vector<16x128xi32>
    %c12_i32 = arith.constant 12 : i32
    %12 = vector.broadcast %c12_i32 : i32 to vector<16x128xi32>
    %13 = arith.cmpi slt, %11, %12 : vector<16x128xi32>
    %cst = arith.constant 0.000000e+00 : f32
    %14 = vector.broadcast %cst : f32 to vector<16x128xf32>
    %15 = arith.select %13, %5, %14 : vector<16x128xi1>, vector<16x128xf32>
    %16 = arith.mulf %15, %15 : vector<16x128xf32>
    %c0_4 = arith.constant 0 : index
    %c0_5 = arith.constant 0 : index
    %17 = vector.load %arg5[%c0_4, %c0_5] : memref<8x128xf32, #tpu.memory_space<vmem>>, vector<8x128xf32>
    %18 = vector.shape_cast %16 : vector<16x128xf32> to vector<2x8x128xf32>
    %cst_6 = arith.constant dense<0.000000e+00> : vector<8x128xf32>
    %19 = vector.multi_reduction <add>, %18, %cst_6 [0] : vector<2x8x128xf32> to vector<8x128xf32>
    %20 = arith.addf %17, %19 : vector<8x128xf32>
    %c0_7 = arith.constant 0 : index
    %c0_8 = arith.constant 0 : index
    %21 = vector.load %arg5[%c0_7, %c0_8] : memref<8x128xf32, #tpu.memory_space<vmem>>, vector<8x128xf32>
    tpu.vector_store %arg5[%c0_7, %c0_8], %20 {strides = array<i32>} : memref<8x128xf32, #tpu.memory_space<vmem>>, vector<8x128xf32>,
    %c0_i32_9 = arith.constant 0 : i32
    %22 = arith.cmpi eq, %arg1, %c0_i32_9 : i32
    %23 = arith.extui %22 : i1 to i32
    %c0_i32_10 = arith.constant 0 : i32
    %24 = arith.cmpi ne, %23, %c0_i32_10 : i32
    scf.if %24 {
      %c0_11 = arith.constant 0 : index
      %c0_12 = arith.constant 0 : index
      %25 = vector.load %arg5[%c0_11, %c0_12] : memref<8x128xf32, #tpu.memory_space<vmem>>, vector<8x128xf32>
      %c0_13 = arith.constant 0 : index
      %c0_14 = arith.constant 0 : index
      %c0_15 = arith.constant 0 : index
      %26 = vector.load %arg4[%c0_13, %c0_14, %c0_15] : memref<1x8x128xf32, #tpu.memory_space<vmem>>, vector<1x8x128xf32>
      %27 = vector.shape_cast %26 : vector<1x8x128xf32> to vector<8x128xf32>
      %28 = vector.shape_cast %25 : vector<8x128xf32> to vector<1x8x128xf32>
      tpu.vector_store %arg4[%c0_13, %c0_14, %c0_15], %28 {strides = array<i32>} : memref<1x8x128xf32, #tpu.memory_space<vmem>>, vector<1x8x128xf32>,
    } else {
    }
    return
  }
  func.func @transform_0(%arg0: i32, %arg1: i32) -> (i32, i32) {
    %c1_i32 = arith.constant 1 : i32
    %0 = arith.muli %arg0, %c1_i32 : i32
    %1 = arith.addi %0, %arg1 : i32
    %c0_i32 = arith.constant 0 : i32
    %2 = arith.minsi %1, %c0_i32 : i32
    %c0_i32_0 = arith.constant 0 : i32
    %c0_i32_1 = arith.constant 0 : i32
    return %2, %c0_i32_0 : i32, i32
  }
  func.func @transform_1(%arg0: i32, %arg1: i32) -> (i32, i32) {
    %c1_i32 = arith.constant 1 : i32
    %0 = arith.muli %arg0, %c1_i32 : i32
    %1 = arith.addi %0, %arg1 : i32
    %c0_i32 = arith.constant 0 : i32
    %2 = arith.minsi %1, %c0_i32 : i32
    %c0_i32_0 = arith.constant 0 : i32
    %c0_i32_1 = arith.constant 0 : i32
    return %2, %c0_i32_0 : i32, i32
  }
  func.func @transform_2(%arg0: i32, %arg1: i32) -> (i32, i32, i32) {
    %c0_i32 = arith.constant 0 : i32
    %c0_i32_0 = arith.constant 0 : i32
    %c0_i32_1 = arith.constant 0 : i32
    return %arg0, %c0_i32, %c0_i32_0 : i32, i32, i32
  }
}

</mosaic_0001>

<bundles_post_ra>
// kernel: tpu_custom_call.1
= control target key start
LH: loop header
LB: loop body
LE: loop exit
PB: predicated region body
PF: predicated region fallthrough
CT: control target
= control target key end

     0   :  { %7 = vsyncpa [#allocation4], 0  ;;  %s214_s0 = inlined_call_operand.hbm [shape: f32[12,128], index: 0, kind: input, shape index: {}]   ;;  %s215_s1 = inlined_call_operand.hbm [shape: f32[12,128], index: 1, kind: input, shape index: {}]   ;;  %s216_s2 = inlined_call_operand.hbm [shape: f32[1,8,128], index: 2, kind: output, shape index: {}]  }
   0x1   :  { %8 = vsyncpa [#allocation7], 0 }
   0x2   :  { %9 = vsyncpa [#allocation5], 0  ;;  %s185_s9 = smov [#allocation3]  }
   0x3   :  { %s21_s10 = sshll.u32 %s185_s9, 4  ;;  %s22_s10 = int_to_ptr.vmem [resolvable:$true] %s21_s10 }
   0x4   :  { %s127_s11 = scalar_lea.vmem %s22_s10, 256  ;;  %p132_p1 = scmp.lt.s32.totalorder %s22_s10, %s22_s10 }
   0x5   :  { %p128_p0 = scmp.ne.s32.totalorder %s22_s10, %s127_s11  ;;  %p133_p2 = scmp.lt.s32.totalorder %s127_s11, %s127_s11 }
   0x7   :  { %p134_p3 = por %p133_p2, %p132_p1 }
   0x9   :  { %p135_p4 = pnand %p134_p3, %p128_p0 }
   0xb   :  { %138 = shalt.err (!%p135_p4)
}
   0xc   :  { %s186_s12 = smov 128   ;;  %s187_s13 = smov 8  }
   0xd   :  { %27 = dma.hbm_to_vmem [thread:$0]  %s214_s0, 256, %s22_s10, [#allocation4], %s186_s12, %s186_s12, %s187_s13  }
   0xe   :  { %s188_s16 = smov [#allocation6]  }
   0xf   :  { %s39_s17 = sshll.u32 %s188_s16, 4  ;;  %s40_s17 = int_to_ptr.vmem [resolvable:$true] %s39_s17 }
  0x10   :  { %s147_s18 = scalar_lea.vmem %s40_s17, 256  ;;  %p152_p6 = scmp.lt.s32.totalorder %s40_s17, %s40_s17 }
  0x11   :  { %p148_p5 = scmp.ne.s32.totalorder %s40_s17, %s147_s18  ;;  %p153_p7 = scmp.lt.s32.totalorder %s147_s18, %s147_s18 }
  0x13   :  { %p154_p8 = por %p153_p7, %p152_p6 }
  0x15   :  { %p155_p9 = pnand %p154_p8, %p148_p5 }
  0x17   :  { %158 = shalt.err (!%p155_p9)
}
  0x18   :  { %45 = dma.hbm_to_vmem [thread:$0]  %s215_s1, 256, %s40_s17, [#allocation7], %s186_s12, %s186_s12, %s187_s13  }
  0x19   :  { %179 = dma.done.wait [#allocation4], 256  }
  0x1a   :  { %180 = vsyncadd [#allocation4], 4294967040 }
  0x1b   :  { %181 = dma.done.wait [#allocation7], 256  }
  0x1c   :  { %182 = vsyncadd [#allocation7], 4294967040  ;;  %v73_v0 = vlaneseq  ;;  %v65_v3 = vld [vmem:[#allocation3] sm:$0xff]  ;;  %v66_v4 = vld [vmem:[#allocation3 + $0x8] sm:$0xff]  ;;  %s189_s0 = smov [#allocation8]  }
  0x1d   :  { %v67_v5 = vld [vmem:[#allocation6] sm:$0xff]  ;;  %v68_v6 = vld [vmem:[#allocation6 + $0x8] sm:$0xff]  ;;  %s100_s21 = sshll.u32 %s189_s0, 4  ;;  %s101_s21 = int_to_ptr.vmem [resolvable:$true] %s100_s21 }
  0x1e   :  { %v74_v1 = vshrl.u32 %v73_v0, 7  ;;  %v69_v7 = vsub.f32 %v65_v3, %v67_v5  ;;  %v70_v8 = vsub.f32 %v66_v4, %v68_v6  ;;  %s159_s1 = scalar_lea.vmem %s101_s21, 128  ;;  %p164_p11 = scmp.lt.s32.totalorder %s101_s21, %s101_s21 }
  0x1f   :  { %p160_p10 = scmp.ne.s32.totalorder %s101_s21, %s159_s1  ;;  %p165_p12 = scmp.lt.s32.totalorder %s159_s1, %s159_s1 }
  0x20   :  { %v75_v2 = vadd.s32 8, %v74_v1  ;;  %v83_v9 = vmul.f32 %v69_v7, %v69_v7 }
  0x21   :  { %p166_p13 = por %p165_p12, %p164_p11 }
  0x22   :  { %vm80_vm0 = vcmp.lt.s32.totalorder %v75_v2, 12 }
  0x23   :  { %v82_v10 = vsel %vm80_vm0, %v70_v8, 0.0  ;;  %p167_p0 = pnand %p166_p13, %p160_p10 }
  0x24   :  { %v84_v11 = vmul.f32 %v82_v10, %v82_v10 }
  0x26   :  { %v86_v12 = vadd.f32 %v84_v11, %v83_v9 }
  0x28   :  { %93 = vst [vmem:[#allocation8] sm:$0xff] %v86_v12 }
  0x29   :  { %170 = shalt.err (!%p167_p0)
}
  0x2a   :  { %103 = dma.vmem_to_hbm [thread:$0]  %s101_s21, 128, %s216_s2, [#allocation5]  }
  0x2b   :  { %183 = dma.done.wait [#allocation5], 128  }
  0x2c   :  { %184 = vsyncadd [#allocation5], 4294967168 }
  0x2d   :  { %107 = vsyncpa [#allocation4], 1 }
  0x2e   :  { %108 = vsyncpa [#allocation7], 1 }
  0x2f   :  { %109 = vsyncpa [#allocation5], 1 }

</bundles_post_ra>
